<compile_context>
chip_gen: v7x
topology: tpu7x:2x2x1
jax: 0.10.0
libtpu: 0.0.40
codegen_flags: <defaults>
</compile_context>

<pallas_src>
import functools
import math

import jax
import jax.numpy as jnp
from jax.experimental import pallas as pl
from jax.experimental.pallas import tpu as pltpu


def _bert_emb2_kernel(x_ref, w_ref, pos_ref, g_ref, beta_ref, o_ref, *, eps):
    # x_ref:    (TM, TK)  activation tile (flattened B*S rows); cast to bf16 for the MXU
    # w_ref:    (TK, H)   bf16  pre-transposed word-embedding linear weight tile
    # pos_ref:  (TM, H)   f32   sinusoidal PE + learned pos-embed + linear bias (pre-summed)
    # g_ref:    (1, H)    f32   LayerNorm gamma
    # beta_ref: (1, H)    f32   LayerNorm beta
    # o_ref:    (TM, H)   f32   output tile; VMEM-resident across K, doubles as accumulator
    k = pl.program_id(1)

    @pl.when(k == 0)
    def _():
        o_ref[...] = jnp.zeros_like(o_ref)

    # bf16 x bf16 -> f32 accumulation: native MXU path on v5e/v6e/v7x.
    o_ref[...] += jnp.dot(
        x_ref[...].astype(jnp.bfloat16), w_ref[...],
        preferred_element_type=jnp.float32)

    @pl.when(k == pl.num_programs(1) - 1)
    def _():
        h = o_ref[...] + pos_ref[...]                     # row-broadcast / per-row add
        # LayerNorm over the hidden (lane) axis — biased variance, like torch.
        mean = jnp.mean(h, axis=-1, keepdims=True)
        centered = h - mean
        var = jnp.mean(centered * centered, axis=-1, keepdims=True)
        normed = centered * jax.lax.rsqrt(var + eps)
        o_ref[...] = (normed * g_ref[...] + beta_ref[...]).astype(o_ref.dtype)


def _vmem_budget():
    """Pick (preferred M tile, vmem_limit_bytes) per TPU generation."""
    try:
        cap = getattr(pltpu.get_tpu_info(), "vmem_capacity_bytes", None)
    except Exception:
        cap = None
    if cap is not None and cap >= 100 * 1024 * 1024:      # v5e / v6e: 128 MiB VMEM
        return 2048, 96 * 1024 * 1024
    return 1024, 48 * 1024 * 1024                         # v7x (64 MiB) / unknown: conservative


def _pick_m_tile(m, preferred):
    """Largest multiple of 8 that divides m and is <= preferred (or m itself)."""
    if m <= preferred:
        return m
    t = (preferred // 8) * 8
    while t >= 8:
        if m % t == 0:
            return t
        t -= 8
    return m


def bert_embeddings2(inputs_embeds, w_vh, b_word, pos_sum, gamma, beta, *,
                     eps, tm=None, tk=None, vmem_limit_bytes=None):
    """inputs_embeds: [B, S, V] (f32 or bf16 — bf16 halves activation HBM traffic).
    w_vh: [V, H] — nn.Linear weight pre-transposed at parameter-load time.
    pos_sum: [S, H] — sinusoidal PE + learned positional embedding, pre-summed.
    Returns [B, S, H] f32.  S must equal max_position_embeddings (module broadcast)."""
    B, S, V = inputs_embeds.shape
    H = w_vh.shape[1]
    M = B * S

    tm_pref, vmem_default = _vmem_budget()
    if tm is None:
        tm = _pick_m_tile(M, tm_pref)
    if tk is None:
        tk = V if V <= 2048 else 2048
    if vmem_limit_bytes is None:
        vmem_limit_bytes = vmem_default
    assert M % tm == 0

    # Flatten (B, S) -> M rows: the bf16 weight is now re-streamed once per
    # M-tile instead of once per (batch, seq-tile).
    x2 = inputs_embeds.reshape(M, V)

    # Zero-pad the vocab (contraction) axis to a multiple of TK — exact for the
    # matmul; handles real vocab sizes (e.g. 30522) that TK does not divide.
    w_bf16 = w_vh.astype(jnp.bfloat16)        # no-op if the weight is stored bf16
    Vp = pl.cdiv(V, tk) * tk
    if Vp != V:
        x2 = jnp.pad(x2, ((0, 0), (0, Vp - V)))
        w_bf16 = jnp.pad(w_bf16, ((0, Vp - V), (0, 0)))
    n_m, n_k = M // tm, Vp // tk

    # Parameter prep (one-time at load in production): fold the linear bias into
    # the positional table and broadcast it over the flattened batch axis.
    pos_all = pos_sum.astype(jnp.float32) + b_word.reshape(1, H).astype(jnp.float32)
    pos_all = jnp.tile(pos_all, (B, 1))                   # (M, H)
    g2 = gamma.reshape(1, H).astype(jnp.float32)
    be2 = beta.reshape(1, H).astype(jnp.float32)

    kernel = functools.partial(_bert_emb2_kernel, eps=eps)

    cost = pl.CostEstimate(
        flops=2 * M * Vp * H,
        transcendentals=0,
        bytes_accessed=(x2.size * x2.dtype.itemsize      # activations
                        + n_m * Vp * H * 2                # bf16 weight stream per M-tile
                        + M * H * 4                       # f32 output
                        + M * H * 4))                     # fused positional table

    out2 = pl.pallas_call(
        kernel,
        # TODO(synk): emit bf16 here (with a separate f32 accumulator scratch)
        # if the downstream encoder consumes bf16 — halves output writeback.
        out_shape=jax.ShapeDtypeStruct((M, H), jnp.float32),
        grid_spec=pltpu.PrefetchScalarGridSpec(
            num_scalar_prefetch=0,
            grid=(n_m, n_k),                              # reduction (vocab) axis last
            in_specs=[
                pl.BlockSpec((tm, tk), lambda m, k: (m, k)),
                pl.BlockSpec((tk, H), lambda m, k: (k, 0)),
                pl.BlockSpec((tm, H), lambda m, k: (m, 0)),
                pl.BlockSpec((1, H), lambda m, k: (0, 0)),
                pl.BlockSpec((1, H), lambda m, k: (0, 0)),
            ],
            out_specs=pl.BlockSpec((tm, H), lambda m, k: (m, 0)),
        ),
        compiler_params=pltpu.CompilerParams(
            dimension_semantics=("parallel", "arbitrary"),
            vmem_limit_bytes=vmem_limit_bytes,
        ),
        cost_estimate=cost,
    )(x2, w_bf16, pos_all, g2, be2)

    return out2.reshape(B, S, H)


def sinusoidal_pe(seq_len, d_model):
    """PositionalEncoding buffer pe[:seq_len, 0, :] -> (seq_len, d_model)."""
    position = jnp.arange(seq_len, dtype=jnp.float32)[:, None]
    div_term = jnp.exp(
        jnp.arange(0, d_model, 2, dtype=jnp.float32) * (-math.log(10000.0) / d_model))
    pe = jnp.zeros((seq_len, d_model), dtype=jnp.float32)
    pe = pe.at[:, 0::2].set(jnp.sin(position * div_term))
    pe = pe.at[:, 1::2].set(jnp.cos(position * div_term))
    return pe


if __name__ == "__main__":
    # Small config: batch=2, seq = max_position_embeddings = 8, vocab=16, hidden=32.
    B, S, V, H = 2, 8, 16, 32
    eps = 1e-12

    key = jax.random.PRNGKey(0)
    k_x, k_w, k_b, k_p2 = jax.random.split(key, 4)

    inputs_embeds = jax.random.normal(k_x, (B, S, V), dtype=jnp.float32)

    # Deterministic synthetic parameters in torch layouts.
    w_word = jax.random.normal(k_w, (H, V), dtype=jnp.float32) * 0.05   # nn.Linear weight [H, V]
    b_word = jax.random.normal(k_b, (H,), dtype=jnp.float32) * 0.02     # nn.Linear bias
    pos_embed2_table = jax.random.normal(k_p2, (S, H), dtype=jnp.float32) * 0.02  # nn.Embedding(max_pos, H)
    gamma = jnp.ones((H,), dtype=jnp.float32)                           # LayerNorm weight
    beta = jnp.zeros((H,), dtype=jnp.float32)                           # LayerNorm bias

    # One-time parameter prep (NOT per-call): transpose to (V, H) and pre-sum
    # the sinusoidal PE with the learned positional table at
    # position_ids = arange(max_position_embeddings).
    w_vh = jnp.asarray(w_word.T)                                        # (V, H)
    pos_sum = sinusoidal_pe(S, H) + pos_embed2_table                    # (S, H)

    # TODO(synk): dropout (hidden_dropout_prob / PositionalEncoding p=0.1) is
    # implemented as identity (eval mode).

    out = bert_embeddings2(inputs_embeds, w_vh, b_word, pos_sum, gamma, beta, eps=eps)
    out = jax.block_until_ready(out)
    assert out.shape == (B, S, H)

    # Reference matching the kernel math exactly (bf16 matmul operands,
    # f32 accumulation + f32 epilogue).
    h_bf = jnp.einsum("bsv,vh->bsh",
                      inputs_embeds.astype(jnp.bfloat16),
                      w_vh.astype(jnp.bfloat16),
                      preferred_element_type=jnp.float32)
    h_bf = h_bf + b_word + pos_sum[None]
    mean = jnp.mean(h_bf, axis=-1, keepdims=True)
    var = jnp.mean((h_bf - mean) ** 2, axis=-1, keepdims=True)
    ref_bf16 = (h_bf - mean) / jnp.sqrt(var + eps) * gamma + beta
    assert jnp.allclose(out, ref_bf16, atol=2e-3, rtol=2e-3), \
        "mismatch vs bf16-matched reference"

    # Looser sanity check against full-f32 math (LayerNorm hides most bf16 error).
    h32 = jnp.einsum("bsv,vh->bsh", inputs_embeds, w_vh) + b_word + pos_sum[None]
    mean32 = jnp.mean(h32, axis=-1, keepdims=True)
    var32 = jnp.mean((h32 - mean32) ** 2, axis=-1, keepdims=True)
    ref_f32 = (h32 - mean32) / jnp.sqrt(var32 + eps) * gamma + beta
    assert jnp.allclose(out, ref_f32, atol=5e-2, rtol=5e-2), \
        "mismatch vs f32 reference"

    print("KERNEL_OK")
</pallas_src>

<mosaic_0001>
module attributes {stable_mosaic.version = 11 : i64} {
  func.func @_bert_emb2_kernel(%arg0: i32, %arg1: i32, %arg2: memref<16x16xf32, #tpu.memory_space<vmem>>, %arg3: memref<16x32xbf16, #tpu.memory_space<vmem>>, %arg4: memref<16x32xf32, #tpu.memory_space<vmem>>, %arg5: memref<1x32xf32, #tpu.memory_space<vmem>>, %arg6: memref<1x32xf32, #tpu.memory_space<vmem>>, %arg7: memref<16x32xf32, #tpu.memory_space<vmem>>) attributes {dimension_semantics = [#tpu.dimension_semantics<parallel>, #tpu.dimension_semantics<arbitrary>], iteration_bounds = array<i64: 1, 1>, scalar_prefetch = 0 : i64, scratch_operands = 0 : i64, tpu.core_type = #tpu.core_type<tc>, window_params = [{transform_indices = @transform_0, window_bounds = array<i64: 16, 16>}, {transform_indices = @transform_1, window_bounds = array<i64: 16, 32>}, {transform_indices = @transform_2, window_bounds = array<i64: 16, 32>}, {pipeline_mode = #tpu.pipeline_mode<synchronous>, transform_indices = @transform_3, window_bounds = array<i64: 1, 32>}, {pipeline_mode = #tpu.pipeline_mode<synchronous>, transform_indices = @transform_4, window_bounds = array<i64: 1, 32>}, {transform_indices = @transform_5, window_bounds = array<i64: 16, 32>}]} {
    %c0_i32 = arith.constant 0 : i32
    %0 = arith.cmpi eq, %arg1, %c0_i32 : i32
    %1 = arith.extui %0 : i1 to i32
    %c0_i32_0 = arith.constant 0 : i32
    %2 = arith.cmpi ne, %1, %c0_i32_0 : i32
    scf.if %2 {
      %cst_10 = arith.constant 0.000000e+00 : f32
      %13 = vector.broadcast %cst_10 : f32 to vector<16x32xf32>
      %c0_11 = arith.constant 0 : index
      %c0_12 = arith.constant 0 : index
      %14 = vector.load %arg7[%c0_11, %c0_12] : memref<16x32xf32, #tpu.memory_space<vmem>>, vector<16x32xf32>
      tpu.vector_store %arg7[%c0_11, %c0_12], %13 {strides = array<i32>} : memref<16x32xf32, #tpu.memory_space<vmem>>, vector<16x32xf32>,
    } else {
    }
    %c0 = arith.constant 0 : index
    %c0_1 = arith.constant 0 : index
    %3 = vector.load %arg7[%c0, %c0_1] : memref<16x32xf32, #tpu.memory_space<vmem>>, vector<16x32xf32>
    %c0_2 = arith.constant 0 : index
    %c0_3 = arith.constant 0 : index
    %4 = vector.load %arg2[%c0_2, %c0_3] : memref<16x16xf32, #tpu.memory_space<vmem>>, vector<16x16xf32>
    %5 = arith.truncf %4 : vector<16x16xf32> to vector<16x16xbf16>
    %c0_4 = arith.constant 0 : index
    %c0_5 = arith.constant 0 : index
    %6 = vector.load %arg3[%c0_4, %c0_5] : memref<16x32xbf16, #tpu.memory_space<vmem>>, vector<16x32xbf16>
    %cst = arith.constant dense<0.000000e+00> : vector<16x32xf32>
    %7 = tpu.matmul %5, %6, %cst {dimension_numbers = #tpu.dot_dimension_numbers<[1], [0], [0], [1], [0, 0, 1, 1], [], []>} : vector<16x16xbf16>, vector<16x32xbf16>, vector<16x32xf32> -> vector<16x32xf32>
    %8 = arith.addf %3, %7 : vector<16x32xf32>
    %c0_6 = arith.constant 0 : index
    %c0_7 = arith.constant 0 : index
    %9 = vector.load %arg7[%c0_6, %c0_7] : memref<16x32xf32, #tpu.memory_space<vmem>>, vector<16x32xf32>
    tpu.vector_store %arg7[%c0_6, %c0_7], %8 {strides = array<i32>} : memref<16x32xf32, #tpu.memory_space<vmem>>, vector<16x32xf32>,
    %c0_i32_8 = arith.constant 0 : i32
    %10 = arith.cmpi eq, %arg1, %c0_i32_8 : i32
    %11 = arith.extui %10 : i1 to i32
    %c0_i32_9 = arith.constant 0 : i32
    %12 = arith.cmpi ne, %11, %c0_i32_9 : i32
    scf.if %12 {
      %c0_10 = arith.constant 0 : index
      %c0_11 = arith.constant 0 : index
      %13 = vector.load %arg7[%c0_10, %c0_11] : memref<16x32xf32, #tpu.memory_space<vmem>>, vector<16x32xf32>
      %c0_12 = arith.constant 0 : index
      %c0_13 = arith.constant 0 : index
      %14 = vector.load %arg4[%c0_12, %c0_13] : memref<16x32xf32, #tpu.memory_space<vmem>>, vector<16x32xf32>
      %15 = arith.addf %13, %14 : vector<16x32xf32>
      %cst_14 = arith.constant dense<0.000000e+00> : vector<16xf32>
      %16 = vector.multi_reduction <add>, %15, %cst_14 [1] : vector<16x32xf32> to vector<16xf32>
      %17 = vector.shape_cast %16 : vector<16xf32> to vector<16x1xf32>
      %cst_15 = arith.constant 3.200000e+01 : f32
      %18 = vector.broadcast %cst_15 : f32 to vector<16x1xf32>
      %19 = arith.divf %17, %18 : vector<16x1xf32>
      %20 = vector.broadcast %19 : vector<16x1xf32> to vector<16x32xf32>
      %21 = arith.subf %15, %20 : vector<16x32xf32>
      %22 = arith.mulf %21, %21 : vector<16x32xf32>
      %cst_16 = arith.constant dense<0.000000e+00> : vector<16xf32>
      %23 = vector.multi_reduction <add>, %22, %cst_16 [1] : vector<16x32xf32> to vector<16xf32>
      %24 = vector.shape_cast %23 : vector<16xf32> to vector<16x1xf32>
      %cst_17 = arith.constant 3.200000e+01 : f32
      %25 = vector.broadcast %cst_17 : f32 to vector<16x1xf32>
      %26 = arith.divf %24, %25 : vector<16x1xf32>
      %cst_18 = arith.constant 9.99999996E-13 : f32
      %27 = vector.broadcast %cst_18 : f32 to vector<16x1xf32>
      %28 = arith.addf %26, %27 : vector<16x1xf32>
      %29 = math.rsqrt %28 : vector<16x1xf32>
      %30 = vector.broadcast %29 : vector<16x1xf32> to vector<16x32xf32>
      %31 = arith.mulf %21, %30 : vector<16x32xf32>
      %c0_19 = arith.constant 0 : index
      %c0_20 = arith.constant 0 : index
      %32 = vector.load %arg5[%c0_19, %c0_20] : memref<1x32xf32, #tpu.memory_space<vmem>>, vector<1x32xf32>
      %33 = vector.broadcast %32 : vector<1x32xf32> to vector<16x32xf32>
      %34 = arith.mulf %31, %33 : vector<16x32xf32>
      %c0_21 = arith.constant 0 : index
      %c0_22 = arith.constant 0 : index
      %35 = vector.load %arg6[%c0_21, %c0_22] : memref<1x32xf32, #tpu.memory_space<vmem>>, vector<1x32xf32>
      %36 = vector.broadcast %35 : vector<1x32xf32> to vector<16x32xf32>
      %37 = arith.addf %34, %36 : vector<16x32xf32>
      %c0_23 = arith.constant 0 : index
      %c0_24 = arith.constant 0 : index
      %38 = vector.load %arg7[%c0_23, %c0_24] : memref<16x32xf32, #tpu.memory_space<vmem>>, vector<16x32xf32>
      tpu.vector_store %arg7[%c0_23, %c0_24], %37 {strides = array<i32>} : memref<16x32xf32, #tpu.memory_space<vmem>>, vector<16x32xf32>,
    } else {
    }
    return
  }
  func.func @transform_0(%arg0: i32, %arg1: i32) -> (i32, i32) {
    %c0_i32 = arith.constant 0 : i32
    return %arg0, %arg1 : i32, i32
  }
  func.func @transform_1(%arg0: i32, %arg1: i32) -> (i32, i32) {
    %c0_i32 = arith.constant 0 : i32
    %c0_i32_0 = arith.constant 0 : i32
    return %arg1, %c0_i32 : i32, i32
  }
  func.func @transform_2(%arg0: i32, %arg1: i32) -> (i32, i32) {
    %c0_i32 = arith.constant 0 : i32
    %c0_i32_0 = arith.constant 0 : i32
    return %arg0, %c0_i32 : i32, i32
  }
  func.func @transform_3(%arg0: i32, %arg1: i32) -> (i32, i32) {
    %c0_i32 = arith.constant 0 : i32
    %c0_i32_0 = arith.constant 0 : i32
    %c0_i32_1 = arith.constant 0 : i32
    return %c0_i32, %c0_i32_0 : i32, i32
  }
  func.func @transform_4(%arg0: i32, %arg1: i32) -> (i32, i32) {
    %c0_i32 = arith.constant 0 : i32
    %c0_i32_0 = arith.constant 0 : i32
    %c0_i32_1 = arith.constant 0 : i32
    return %c0_i32, %c0_i32_0 : i32, i32
  }
  func.func @transform_5(%arg0: i32, %arg1: i32) -> (i32, i32) {
    %c0_i32 = arith.constant 0 : i32
    %c0_i32_0 = arith.constant 0 : i32
    return %arg0, %c0_i32 : i32, i32
  }
}

</mosaic_0001>

<bundles_post_ra>
// kernel: tpu_custom_call.1
= control target key start
LH: loop header
LB: loop body
LE: loop exit
PB: predicated region body
PF: predicated region fallthrough
CT: control target
= control target key end

     0   :  { %10 = vsyncpa [#allocation3], 0  ;;  %s441_s0 = inlined_call_operand.hbm [shape: f32[16,16], index: 0, kind: input, shape index: {}]   ;;  %s442_s1 = inlined_call_operand.hbm [shape: bf16[16,32], index: 1, kind: input, shape index: {}]   ;;  %s443_s2 = inlined_call_operand.hbm [shape: f32[16,32], index: 2, kind: input, shape index: {}]   ;;  %s444_s3 = inlined_call_operand.vmem [shape: f32[1,32], index: 3, kind: input, shape index: {}]   ;;  %s445_s4 = inlined_call_operand.vmem [shape: f32[1,32], index: 4, kind: input, shape index: {}]   ;;  %s446_s5 = inlined_call_operand.hbm [shape: f32[16,32], index: 5, kind: output, shape index: {}]  }
   0x1   :  { %11 = vsyncpa [#allocation6], 0 }
   0x2   :  { %12 = vsyncpa [#allocation4], 0  ;;  %s328_s18 = smov [#allocation5]   ;;  %s234_s22 = scalar_lea.hbm %s442_s1, 128 }
   0x3   :  { %s30_s19 = sshll.u32 %s328_s18, 4  ;;  %p235_p0 = scmp.ne.s32.totalorder %s442_s1, %s234_s22  ;;  %s31_s19 = int_to_ptr.vmem [resolvable:$true] %s30_s19 }
   0x4   :  { %p238_p1 = scmp.lt.u32.totalorder %s234_s22, %s442_s1 }
   0x6   :  { %p240_p2 = pnand %p238_p1, %p235_p0 }
   0x8   :  { %243 = shalt.err (!%p240_p2)
}
   0x9   :  { %s244_s27 = scalar_lea.vmem %s31_s19, 128  ;;  %p249_p4 = scmp.lt.s32.totalorder %s31_s19, %s31_s19 }
   0xa   :  { %p245_p3 = scmp.ne.s32.totalorder %s31_s19, %s244_s27  ;;  %p250_p5 = scmp.lt.s32.totalorder %s244_s27, %s244_s27 }
   0xc   :  { %p251_p6 = por %p250_p5, %p249_p4 }
   0xe   :  { %p252_p7 = pnand %p251_p6, %p245_p3 }
  0x10   :  { %255 = shalt.err (!%p252_p7)
}
  0x11   :  { %s329_s28 = smov 64   ;;  %s330_s29 = smov 4  }
  0x12   :  { %36 = dma.hbm_to_vmem [thread:$0]  %s442_s1, 128, %s31_s19, [#allocation6], %s329_s28, %s329_s28, %s330_s29  }
  0x13   :  { %s331_s7 = smov [#allocation2]   ;;  %s256_s11 = scalar_lea.hbm %s441_s0, 256 }
  0x14   :  { %s18_s8 = sshll.u32 %s331_s7, 4  ;;  %p257_p8 = scmp.ne.s32.totalorder %s441_s0, %s256_s11  ;;  %s19_s8 = int_to_ptr.vmem [resolvable:$true] %s18_s8 }
  0x15   :  { %p260_p9 = scmp.lt.u32.totalorder %s256_s11, %s441_s0 }
  0x17   :  { %p262_p10 = pnand %p260_p9, %p257_p8 }
  0x19   :  { %265 = shalt.err (!%p262_p10)
}
  0x1a   :  { %s266_s16 = scalar_lea.vmem %s19_s8, 256  ;;  %p271_p12 = scmp.lt.s32.totalorder %s19_s8, %s19_s8 }
  0x1b   :  { %p267_p11 = scmp.ne.s32.totalorder %s19_s8, %s266_s16  ;;  %p272_p13 = scmp.lt.s32.totalorder %s266_s16, %s266_s16 }
  0x1d   :  { %p273_p0 = por %p272_p13, %p271_p12 }
  0x1f   :  { %p274_p1 = pnand %p273_p0, %p267_p11 }
  0x21   :  { %277 = shalt.err (!%p274_p1)
}
  0x22   :  { %s332_s1 = smov 128   ;;  %s333_s17 = smov 8  }
  0x23   :  { %24 = dma.hbm_to_vmem [thread:$0]  %s441_s0, 256, %s19_s8, [#allocation3], %s332_s1, %s332_s1, %s333_s17  }
  0x24   :  { %s334_s20 = smov [#allocation7]   ;;  %s278_s24 = scalar_lea.hbm %s443_s2, 256 }
  0x25   :  { %s42_s21 = sshll.u32 %s334_s20, 4  ;;  %p279_p2 = scmp.ne.s32.totalorder %s443_s2, %s278_s24  ;;  %s43_s21 = int_to_ptr.vmem [resolvable:$true] %s42_s21 }
  0x26   :  { %p282_p3 = scmp.lt.u32.totalorder %s278_s24, %s443_s2 }
  0x28   :  { %p284_p4 = pnand %p282_p3, %p279_p2 }
  0x2a   :  { %287 = shalt.err (!%p284_p4)
}
  0x2b   :  { %s288_s29 = scalar_lea.vmem %s43_s21, 256  ;;  %p293_p6 = scmp.lt.s32.totalorder %s43_s21, %s43_s21 }
  0x2c   :  { %p289_p5 = scmp.ne.s32.totalorder %s43_s21, %s288_s29  ;;  %p294_p7 = scmp.lt.s32.totalorder %s288_s29, %s288_s29 }
  0x2e   :  { %p295_p8 = por %p294_p7, %p293_p6 }
  0x30   :  { %p296_p9 = pnand %p295_p8, %p289_p5 }
  0x32   :  { %299 = shalt.err (!%p296_p9)
}
  0x33   :  { %48 = dma.hbm_to_vmem [thread:$0]  %s443_s2, 256, %s43_s21, [#allocation6], %s332_s1, %s332_s1, %s333_s17  }
  0x34   :  { %322 = dma.done.wait [#allocation3], 256  }
  0x35   :  { %323 = vsyncadd [#allocation3], 4294967040 }
  0x36   :  { %324 = dma.done.wait [#allocation6], 384  }
  0x37   :  { %325 = vsyncadd [#allocation6], 4294966912  ;;  %vm67_vm0 = vcmask 261120   ;;  %v335_v0 = vmov 0.0   ;;  %vm336_vm1 = vmmov 0   ;;  %v229_v1 = vld [vmem:[#allocation5] sm:$0xff]  }
  0x38   :  { %68 = vst.msk [vmem:[#allocation8] sm:$0xff] %vm67_vm0, %v335_v0  ;;  %69 = vst.msk [vmem:[#allocation8 + $0x8] sm:$0xff] %vm67_vm0, %v335_v0  ;;  %213 = vmatprep.subr.bf16.mxu0 %v335_v0  ;;  %215 = vmatprep.mubr.msk.bf16.mxu0 %vm336_vm1, %v335_v0  ;;  %v72_v2 = vld [vmem:[#allocation2] sm:$0xff]  ;;  %v73_v3 = vld [vmem:[#allocation2 + $0x8] sm:$0xff]  ;;  %vm83_vm2 = vcmask 130048   ;;  %s337_s9 = smov [#allocation8]  }
  0x39   :  { %214 = vmatpush3.bf16.msra.mxu0 %v229_v1  ;;  %v74_v4 = vpack.c.bf16 %v73_v3, %v72_v2  ;;  %v138_v13 = vld [vmem:[#allocation7] sm:$0xff]  ;;  %v139_v15 = vld [vmem:[#allocation7 + $0x8] sm:$0xff]  ;;  %s194_s10 = sshll.u32 %s337_s9, 4  ;;  %s195_s10 = int_to_ptr.vmem [resolvable:$true] %s194_s10 }
  0x3a   :  { %v209_v38 = vld [vmem:[%s444_s3] ss:$0 sm:$0xff]  ;;  %s300_s11 = scalar_lea.vmem %s195_s10, 256  ;;  %p305_p11 = scmp.lt.s32.totalorder %s195_s10, %s195_s10 }
  0x3b   :  { %v210_v40 = vld [vmem:[%s445_s4] ss:$0 sm:$0xff]  ;;  %p301_p10 = scmp.ne.s32.totalorder %s195_s10, %s300_s11  ;;  %p306_p12 = scmp.lt.s32.totalorder %s300_s11, %s300_s11 }
  0x3c   :  { %216 = vmatmul.mubr.msk.bf16.vlgmr.msra.gmra.mrb[0].mxu0 %vm83_vm2, %v74_v4 }
  0x3d   :  { %p307_p13 = por %p306_p12, %p305_p11 }
  0x3f   :  { %v70_v5 = vld [vmem:[#allocation8] sm:$0xff]  ;;  %v71_v7 = vld [vmem:[#allocation8 + $0x8] sm:$0xff]  ;;  %p308_p0 = pnand %p307_p13, %p301_p10 }
 0x10f   :  { %v121_v6 = vpop.f32.mrb[0].mxu0 }
 0x110   :  { %v128_v8 = vadd.f32 %v121_v6, %v70_v5  ;;  %v217_v9 = vpop.f32.mrb[1].mxu0 }
 0x111   :  { %v124_v10 = vpop.f32.mrb[2].mxu0 }
 0x112   :  { %131 = vst.msk [vmem:[#allocation8] sm:$0xff] %vm67_vm0, %v128_v8  ;;  %v129_v11 = vadd.f32 %v124_v10, %v71_v7  ;;  %v218_v12 = vpop.f32.mrb[3].mxu0 }
 0x114   :  { %132 = vst.msk [vmem:[#allocation8 + $0x8] sm:$0xff] %vm67_vm0, %v129_v11 }
 0x119   :  { %v136_v14 = vld [vmem:[#allocation8] sm:$0xff] }
 0x11a   :  { %v140_v16 = vadd.f32 %v138_v13, %v136_v14 }
 0x11b   :  { %v137_v17 = vld [vmem:[#allocation8 + $0x8] sm:$0xff] }
 0x11c   :  { %v142_v18 = vsel %vm67_vm0, %v140_v16, 0.0  ;;  %v141_v19 = vadd.f32 %v139_v15, %v137_v17 }
 0x11d   :  { %143 = vadd.xlane.f32.xlu0 %v142_v18 }
 0x11e   :  { %v145_v20 = vsel %vm67_vm0, %v141_v19, 0.0 }
 0x121   :  { %146 = vadd.xlane.f32.xlu0 %v145_v20 }
 0x1aa   :  { %v144_v21 = vpop.xlane.xlu0 %143 }
 0x1ab   :  { %v149_v22 = vmul.f32 0.03125, %v144_v21 }
 0x1ad   :  { %v151_v23 = vsub.f32 %v140_v16, %v149_v22 }
 0x1ae   :  { %v147_v24 = vpop.xlane.xlu0 %146 }
 0x1af   :  { %v150_v25 = vmul.f32 0.03125, %v147_v24  ;;  %v153_v26 = vmul.f32 %v151_v23, %v151_v23 }
 0x1b1   :  { %v152_v27 = vsub.f32 %v141_v19, %v150_v25  ;;  %v155_v28 = vsel %vm67_vm0, %v153_v26, 0.0 }
 0x1b2   :  { %156 = vadd.xlane.f32.xlu1 %v155_v28 }
 0x1b3   :  { %v154_v29 = vmul.f32 %v152_v27, %v152_v27 }
 0x1b5   :  { %v158_v30 = vsel %vm67_vm0, %v154_v29, 0.0 }
 0x1b6   :  { %159 = vadd.xlane.f32.xlu1 %v158_v30 }
 0x23f   :  { %v157_v31 = vpop.xlane.xlu1 %156 }
 0x240   :  { %v161_v32 = vmul.f32 0.03125, %v157_v31 }
 0x242   :  { %v163_v33 = vadd.f32 1e-12, %v161_v32 }
 0x243   :  { %v160_v34 = vpop.xlane.xlu1 %159 }
 0x244   :  { %230 = vrsqrt.f32 %v163_v33  ;;  %v162_v35 = vmul.f32 0.03125, %v160_v34 }
 0x246   :  { %v164_v36 = vadd.f32 1e-12, %v162_v35 }
 0x248   :  { %232 = vrsqrt.f32 %v164_v36 }
 0x24e   :  { %v231_v37 = vpop.eup %230 }
 0x24f   :  { %v167_v39 = vmul.f32 %v231_v37, %v151_v23 }
 0x251   :  { %v176_v41 = vmul.f32 %v209_v38, %v167_v39 }
 0x252   :  { %v233_v42 = vpop.eup %232 }
 0x253   :  { %v168_v43 = vmul.f32 %v233_v42, %v152_v27  ;;  %v185_v44 = vadd.f32 %v210_v40, %v176_v41 }
 0x255   :  { %v177_v45 = vmul.f32 %v209_v38, %v168_v43  ;;  %187 = vst.msk [vmem:[#allocation8] sm:$0xff] %vm67_vm0, %v185_v44 }
 0x257   :  { %v186_v46 = vadd.f32 %v210_v40, %v177_v45 }
 0x259   :  { %188 = vst.msk [vmem:[#allocation8 + $0x8] sm:$0xff] %vm67_vm0, %v186_v46 }
 0x25a   :  { %311 = shalt.err (!%p308_p0)
}
 0x25b   :  { %s312_s12 = scalar_lea.hbm %s446_s5, 256 }
 0x25c   :  { %p313_p1 = scmp.ne.s32.totalorder %s446_s5, %s312_s12  ;;  %p316_p2 = scmp.lt.u32.totalorder %s312_s12, %s446_s5 }
 0x25e   :  { %p318_p3 = pnand %p316_p2, %p313_p1 }
 0x260   :  { %321 = shalt.err (!%p318_p3)
}
 0x261   :  { %200 = dma.vmem_to_hbm [thread:$0]  %s195_s10, 256, %s446_s5, [#allocation4], %s332_s1, %s332_s1, %s333_s17  }
 0x262   :  { %326 = dma.done.wait [#allocation4], 256  }
 0x263   :  { %327 = vsyncadd [#allocation4], 4294967040 }
 0x264   :  { %204 = vsyncpa [#allocation3], 1 }
 0x265   :  { %205 = vsyncpa [#allocation6], 1 }
 0x266   :  { %206 = vsyncpa [#allocation4], 1 }

</bundles_post_ra>
